<compile_context>
chip_gen: v7x
topology: tpu7x:2x2x1
jax: 0.10.0
libtpu: 0.0.40
codegen_flags: <defaults>
</compile_context>

<pallas_src>
import jax
import jax.numpy as jnp
from jax.experimental import pallas as pl
from jax.experimental.pallas import tpu as pltpu


_NEG_BIG = -1e30  # finite stand-in for -inf; masked lanes underflow to exactly 0


def _round_up(v, m):
    return (v + m - 1) // m * m


def _aligned_embedding_kernel(x_ref, y_ref, mbias_ref, wt_ref, b_ref, out_ref):
    """One batch tile of the fused forward pass.

    x_ref:     (TB, Sxp, Hp)  bf16
    y_ref:     (TB, Syp, Hp)  bf16
    mbias_ref: (TB, 1,  Syp)  f32 additive mask (0 = valid, -1e30 = masked/pad)
    wt_ref:    (Hp, Hp)       bf16, pre-transposed Linear weight (z = v @ wt + b)
    b_ref:     (1, Hp)        f32 Linear bias
    out_ref:   (TB, Sxp, Hp)  f32
    """
    TB, Sx, H = x_ref.shape
    Sy = y_ref.shape[1]

    wt = wt_ref[...]
    bias = b_ref[...]                                   # (1, Hp) f32

    # Shared Linear + ReLU.  Collapse (TB, S, H) -> (TB*S, H) so each
    # projection is ONE tall MXU matmul instead of TB under-filled ones.
    # (Sxp/Syp are multiples of 16 and Hp a multiple of 128, so the leading-dim
    # merge is a free relayout.)
    x2 = x_ref[...].reshape(TB * Sx, H)
    y2 = y_ref[...].reshape(TB * Sy, H)
    x_emb = jnp.maximum(
        jnp.dot(x2, wt, preferred_element_type=jnp.float32) + bias, 0.0)
    y_emb = jnp.maximum(
        jnp.dot(y2, wt, preferred_element_type=jnp.float32) + bias, 0.0)

    # Attention scores (TB, Sxp, Syp): bf16 MXU operands, f32 accumulation.
    xe = x_emb.astype(jnp.bfloat16).reshape(TB, Sx, H)
    ye = y_emb.astype(jnp.bfloat16).reshape(TB, Sy, H)
    scores = jnp.einsum("bqh,bkh->bqk", xe, ye,
                        preferred_element_type=jnp.float32)
    scores = scores + mbias_ref[...]                    # additive mask, bcast over Sx

    # Numerically-stable softmax over Sy, all in f32 (v5e has no bf16 VPU/EUP).
    # Masked / padded keys sit at -1e30, so exp(masked - m) == 0 exactly.
    # NOTE: a row whose keys are ALL masked yields a uniform alpha (mean of y)
    # instead of PyTorch's NaN from masked_fill(-inf)+softmax.
    m = jnp.max(scores, axis=-1, keepdims=True)
    e = jnp.exp(scores - m)
    denom = jnp.sum(e, axis=-1, keepdims=True)
    alpha = e * (1.0 / denom)        # exact reciprocal of the tiny (TB,Sx,1) tensor

    # Weighted sum of the *raw* y embeddings: (TB, Sxp, Hp).
    out = jnp.einsum("bqk,bkh->bqh", alpha.astype(jnp.bfloat16), y_ref[...],
                     preferred_element_type=jnp.float32)
    out_ref[...] = out.astype(out_ref.dtype)


def _default_vmem_budget_bytes():
    """Generation-aware per-step VMEM budget (v5e/v6e: 128 MiB, v7x: 64 MiB/TC)."""
    try:
        cap = int(getattr(pltpu.get_tpu_info(), "vmem_capacity_bytes", 0))
    except Exception:
        cap = 0
    if cap > 0:
        return min(int(cap * 0.45), 96 * 1024 * 1024)
    return 24 * 1024 * 1024  # conservative fallback that fits every generation


def _footprint_bytes(tb, sx, sy, h):
    """Per-grid-step VMEM footprint: double-buffered IO blocks + live temporaries."""
    bf16, f32 = 2, 4
    io = 2 * tb * (sx * h * bf16 + sy * h * bf16 + sy * f32 + sx * h * f32)
    shared = 2 * (h * h * bf16 + h * f32)                 # weight + bias blocks
    temps = tb * ((sx * h + sy * h) * (f32 + bf16)        # x_emb/y_emb + bf16 copies
                  + sx * sy * (4 * f32 + bf16)            # scores/e/alpha live set
                  + sx * h * f32)                         # f32 out before store
    return int((io + shared + temps) * 1.2)               # ~20% compiler-scratch headroom


def _pick_batch_tile(B, sx, sy, h, budget_bytes):
    """Largest TB dividing B that fits the budget, leaving >=2 grid steps (v7x)."""
    cap = max(1, B // 2)   # keep >=2 "parallel" steps so both v7x TCs get work
    for tb in range(cap, 0, -1):
        if B % tb == 0 and _footprint_bytes(tb, sx, sy, h) <= budget_bytes:
            return tb
    # TODO(synk): switch to an Sy-streaming online-softmax path instead of failing.
    raise ValueError(
        f"AlignedEmbedding tile does not fit the VMEM budget "
        f"({_footprint_bytes(1, sx, sy, h)} > {budget_bytes} bytes); "
        "Sy streaming is required for sequences this long.")


def aligned_embedding(x, y, y_mask, weight, bias, *, vmem_budget_bytes=None):
    """
    x:      (B, Sx, H) f32
    y:      (B, Sy, H) f32
    y_mask: (B, Sy)    int/bool (nonzero = masked / pad)
    weight: (H, H)     f32, PyTorch nn.Linear weight (out_features, in_features)
    bias:   (H,)       f32
    returns (B, Sx, H) f32
    """
    B, Sx, H = x.shape
    _, Sy, _ = y.shape
    assert weight.shape == (H, H) and bias.shape == (H,)

    # Lane/sublane padding: H is the lane dim of every matmul operand and of
    # the output (lane-dense stores); Sy is the lane dim of the softmax tile.
    Hp = _round_up(H, 128)
    Sxp = _round_up(Sx, 16)     # bf16 sublane packing
    Syp = _round_up(Sy, 128)

    # bf16 MXU operands (half the HBM traffic); padded keys get mask = -1e30 so
    # they contribute exactly 0 after the softmax; padded H lanes are all-zero.
    xp = jnp.zeros((B, Sxp, Hp), jnp.bfloat16).at[:, :Sx, :H].set(
        x.astype(jnp.bfloat16))
    yp = jnp.zeros((B, Syp, Hp), jnp.bfloat16).at[:, :Sy, :H].set(
        y.astype(jnp.bfloat16))
    mbias = jnp.full((B, 1, Syp), _NEG_BIG, jnp.float32).at[:, 0, :Sy].set(
        jnp.where(y_mask != 0, jnp.float32(_NEG_BIG), jnp.float32(0.0)))
    wt = jnp.zeros((Hp, Hp), jnp.bfloat16).at[:H, :H].set(
        weight.astype(jnp.bfloat16).T)      # kernel computes v @ wt (+ b)
    b2 = jnp.zeros((1, Hp), jnp.float32).at[:, :H].set(bias.astype(jnp.float32))

    if vmem_budget_bytes is None:
        vmem_budget_bytes = _default_vmem_budget_bytes()
    tb = _pick_batch_tile(B, Sxp, Syp, Hp, vmem_budget_bytes)
    grid = (B // tb,)

    out_padded = pl.pallas_call(
        _aligned_embedding_kernel,
        out_shape=jax.ShapeDtypeStruct((B, Sxp, Hp), jnp.float32),
        grid=grid,
        in_specs=[
            pl.BlockSpec((tb, Sxp, Hp), lambda i: (i, 0, 0)),   # x batch tile
            pl.BlockSpec((tb, Syp, Hp), lambda i: (i, 0, 0)),   # y batch tile
            pl.BlockSpec((tb, 1, Syp),  lambda i: (i, 0, 0)),   # additive mask
            pl.BlockSpec((Hp, Hp),      lambda i: (0, 0)),      # weight (shared)
            pl.BlockSpec((1, Hp),       lambda i: (0, 0)),      # bias   (shared)
        ],
        out_specs=pl.BlockSpec((tb, Sxp, Hp), lambda i: (i, 0, 0)),
        compiler_params=pltpu.CompilerParams(
            dimension_semantics=("parallel",),
            vmem_limit_bytes=int(vmem_budget_bytes)),
    )(xp, yp, mbias, wt, b2)

    return out_padded[:, :Sx, :H]


def _reference(x, y, y_mask, weight, bias):
    # Plain-JAX replica of the PyTorch forward (pure f32).
    x_emb = jax.nn.relu(jnp.einsum("bsh,oh->bso", x, weight) + bias)
    y_emb = jax.nn.relu(jnp.einsum("bsh,oh->bso", y, weight) + bias)
    scores = jnp.einsum("bqh,bkh->bqk", x_emb, y_emb)
    scores = jnp.where(y_mask[:, None, :] != 0, -jnp.inf, scores)
    alpha = jax.nn.softmax(scores, axis=-1)
    return jnp.einsum("bqk,bkh->bqh", alpha, y)


if __name__ == "__main__":
    B, Sx, Sy, H = 2, 8, 12, 32
    key = jax.random.PRNGKey(0)
    kx, ky, kw, kb = jax.random.split(key, 4)

    x = jax.random.normal(kx, (B, Sx, H), dtype=jnp.float32)
    y = jax.random.normal(ky, (B, Sy, H), dtype=jnp.float32)
    # Deterministic "Linear(embed_size, embed_size)" parameters.
    weight = jax.random.normal(kw, (H, H), dtype=jnp.float32) * 0.1
    bias = jax.random.normal(kb, (H,), dtype=jnp.float32) * 0.1
    # Mask out the last three positions of batch element 1 (padding in y).
    y_mask = jnp.zeros((B, Sy), dtype=jnp.int32)
    y_mask = y_mask.at[1, Sy - 3:].set(1)

    out = aligned_embedding(x, y, y_mask, weight, bias)
    out = jax.block_until_ready(out)
    assert out.shape == (B, Sx, H)

    ref = _reference(x, y, y_mask, weight, bias)
    # bf16 MXU operands with f32 accumulation -> ~1e-2-scale deviation from the
    # pure-f32 reference at these magnitudes; softmax itself is exact f32.
    assert jnp.allclose(out, ref, atol=7e-2, rtol=7e-2), "mismatch vs reference"

    print("KERNEL_OK")
</pallas_src>

<mosaic_0001>
module attributes {stable_mosaic.version = 11 : i64} {
  func.func @_aligned_embedding_kernel(%arg0: i32, %arg1: memref<1x16x128xbf16, #tpu.memory_space<vmem>>, %arg2: memref<1x128x128xbf16, #tpu.memory_space<vmem>>, %arg3: memref<1x1x128xf32, #tpu.memory_space<vmem>>, %arg4: memref<128x128xbf16, #tpu.memory_space<vmem>>, %arg5: memref<1x128xf32, #tpu.memory_space<vmem>>, %arg6: memref<1x16x128xf32, #tpu.memory_space<vmem>>) attributes {dimension_semantics = [#tpu.dimension_semantics<parallel>], iteration_bounds = array<i64: 2>, scalar_prefetch = 0 : i64, scratch_operands = 0 : i64, tpu.core_type = #tpu.core_type<tc>, window_params = [{transform_indices = @transform_0, window_bounds = array<i64: 1, 16, 128>}, {transform_indices = @transform_1, window_bounds = array<i64: 1, 128, 128>}, {transform_indices = @transform_2, window_bounds = array<i64: 1, 1, 128>}, {pipeline_mode = #tpu.pipeline_mode<synchronous>, transform_indices = @transform_3, window_bounds = array<i64: 128, 128>}, {pipeline_mode = #tpu.pipeline_mode<synchronous>, transform_indices = @transform_4, window_bounds = array<i64: 1, 128>}, {transform_indices = @transform_5, window_bounds = array<i64: 1, 16, 128>}]} {
    %c0 = arith.constant 0 : index
    %c0_0 = arith.constant 0 : index
    %0 = vector.load %arg4[%c0, %c0_0] : memref<128x128xbf16, #tpu.memory_space<vmem>>, vector<128x128xbf16>
    %c0_1 = arith.constant 0 : index
    %c0_2 = arith.constant 0 : index
    %1 = vector.load %arg5[%c0_1, %c0_2] : memref<1x128xf32, #tpu.memory_space<vmem>>, vector<1x128xf32>
    %c0_3 = arith.constant 0 : index
    %c0_4 = arith.constant 0 : index
    %c0_5 = arith.constant 0 : index
    %2 = vector.load %arg1[%c0_3, %c0_4, %c0_5] : memref<1x16x128xbf16, #tpu.memory_space<vmem>>, vector<1x16x128xbf16>
    %3 = vector.shape_cast %2 : vector<1x16x128xbf16> to vector<16x128xbf16>
    %c0_6 = arith.constant 0 : index
    %c0_7 = arith.constant 0 : index
    %c0_8 = arith.constant 0 : index
    %4 = vector.load %arg2[%c0_6, %c0_7, %c0_8] : memref<1x128x128xbf16, #tpu.memory_space<vmem>>, vector<1x128x128xbf16>
    %5 = vector.shape_cast %4 : vector<1x128x128xbf16> to vector<128x128xbf16>
    %cst = arith.constant dense<0.000000e+00> : vector<16x128xf32>
    %6 = tpu.matmul %3, %0, %cst {dimension_numbers = #tpu.dot_dimension_numbers<[1], [0], [0], [1], [0, 0, 1, 1], [], []>} : vector<16x128xbf16>, vector<128x128xbf16>, vector<16x128xf32> -> vector<16x128xf32>
    %7 = vector.broadcast %1 : vector<1x128xf32> to vector<16x128xf32>
    %8 = arith.addf %6, %7 : vector<16x128xf32>
    %cst_9 = arith.constant 0.000000e+00 : f32
    %9 = vector.broadcast %cst_9 : f32 to vector<16x128xf32>
    %10 = arith.maximumf %8, %9 : vector<16x128xf32>
    %cst_10 = arith.constant dense<0.000000e+00> : vector<128x128xf32>
    %11 = tpu.matmul %5, %0, %cst_10 {dimension_numbers = #tpu.dot_dimension_numbers<[1], [0], [0], [1], [0, 0, 1, 1], [], []>} : vector<128x128xbf16>, vector<128x128xbf16>, vector<128x128xf32> -> vector<128x128xf32>
    %12 = vector.broadcast %1 : vector<1x128xf32> to vector<128x128xf32>
    %13 = arith.addf %11, %12 : vector<128x128xf32>
    %cst_11 = arith.constant 0.000000e+00 : f32
    %14 = vector.broadcast %cst_11 : f32 to vector<128x128xf32>
    %15 = arith.maximumf %13, %14 : vector<128x128xf32>
    %16 = arith.truncf %10 : vector<16x128xf32> to vector<16x128xbf16>
    %17 = vector.shape_cast %16 : vector<16x128xbf16> to vector<1x16x128xbf16>
    %18 = arith.truncf %15 : vector<128x128xf32> to vector<128x128xbf16>
    %19 = vector.shape_cast %18 : vector<128x128xbf16> to vector<1x128x128xbf16>
    "tpu.trace_start"() <{level = 10 : i32, message = "bqh,bkh->bqk"}> : () -> ()
    %cst_12 = arith.constant dense<0.000000e+00> : vector<1x16x128xf32>
    %20 = tpu.matmul %17, %19, %cst_12 {dimension_numbers = #tpu.dot_dimension_numbers<[2], [2], [1], [1], [0, 0, 0, 1, 1, 1], [0], [0]>} : vector<1x16x128xbf16>, vector<1x128x128xbf16>, vector<1x16x128xf32> -> vector<1x16x128xf32>
    "tpu.trace_stop"() : () -> ()
    %c0_13 = arith.constant 0 : index
    %c0_14 = arith.constant 0 : index
    %c0_15 = arith.constant 0 : index
    %21 = vector.load %arg3[%c0_13, %c0_14, %c0_15] : memref<1x1x128xf32, #tpu.memory_space<vmem>>, vector<1x1x128xf32>
    %22 = vector.broadcast %21 : vector<1x1x128xf32> to vector<1x16x128xf32>
    %23 = arith.addf %20, %22 : vector<1x16x128xf32>
    %cst_16 = arith.constant dense<0xFF800000> : vector<1x16xf32>
    %24 = vector.multi_reduction <maximumf>, %23, %cst_16 [2] : vector<1x16x128xf32> to vector<1x16xf32>
    %25 = vector.shape_cast %24 : vector<1x16xf32> to vector<1x16x1xf32>
    %26 = vector.broadcast %25 : vector<1x16x1xf32> to vector<1x16x128xf32>
    %27 = arith.subf %23, %26 : vector<1x16x128xf32>
    %28 = math.exp %27 : vector<1x16x128xf32>
    %cst_17 = arith.constant dense<0.000000e+00> : vector<1x16xf32>
    %29 = vector.multi_reduction <add>, %28, %cst_17 [2] : vector<1x16x128xf32> to vector<1x16xf32>
    %30 = vector.shape_cast %29 : vector<1x16xf32> to vector<1x16x1xf32>
    %cst_18 = arith.constant 1.000000e+00 : f32
    %31 = vector.broadcast %cst_18 : f32 to vector<1x16x1xf32>
    %32 = arith.divf %31, %30 : vector<1x16x1xf32>
    %33 = vector.broadcast %32 : vector<1x16x1xf32> to vector<1x16x128xf32>
    %34 = arith.mulf %28, %33 : vector<1x16x128xf32>
    %35 = arith.truncf %34 : vector<1x16x128xf32> to vector<1x16x128xbf16>
    %c0_19 = arith.constant 0 : index
    %c0_20 = arith.constant 0 : index
    %c0_21 = arith.constant 0 : index
    %36 = vector.load %arg2[%c0_19, %c0_20, %c0_21] : memref<1x128x128xbf16, #tpu.memory_space<vmem>>, vector<1x128x128xbf16>
    "tpu.trace_start"() <{level = 10 : i32, message = "bqk,bkh->bqh"}> : () -> ()
    %cst_22 = arith.constant dense<0.000000e+00> : vector<1x16x128xf32>
    %37 = tpu.matmul %35, %36, %cst_22 {dimension_numbers = #tpu.dot_dimension_numbers<[2], [1], [1], [2], [0, 0, 0, 1, 1, 2], [0], [0]>} : vector<1x16x128xbf16>, vector<1x128x128xbf16>, vector<1x16x128xf32> -> vector<1x16x128xf32>
    "tpu.trace_stop"() : () -> ()
    %c0_23 = arith.constant 0 : index
    %c0_24 = arith.constant 0 : index
    %c0_25 = arith.constant 0 : index
    %38 = vector.load %arg6[%c0_23, %c0_24, %c0_25] : memref<1x16x128xf32, #tpu.memory_space<vmem>>, vector<1x16x128xf32>
    tpu.vector_store %arg6[%c0_23, %c0_24, %c0_25], %37 {strides = array<i32>} : memref<1x16x128xf32, #tpu.memory_space<vmem>>, vector<1x16x128xf32>,
    return
  }
  func.func @transform_0(%arg0: i32) -> (i32, i32, i32) {
    %c0_i32 = arith.constant 0 : i32
    %c0_i32_0 = arith.constant 0 : i32
    %c0_i32_1 = arith.constant 0 : i32
    return %arg0, %c0_i32, %c0_i32_0 : i32, i32, i32
  }
  func.func @transform_1(%arg0: i32) -> (i32, i32, i32) {
    %c0_i32 = arith.constant 0 : i32
    %c0_i32_0 = arith.constant 0 : i32
    %c0_i32_1 = arith.constant 0 : i32
    return %arg0, %c0_i32, %c0_i32_0 : i32, i32, i32
  }
  func.func @transform_2(%arg0: i32) -> (i32, i32, i32) {
    %c0_i32 = arith.constant 0 : i32
    %c0_i32_0 = arith.constant 0 : i32
    %c0_i32_1 = arith.constant 0 : i32
    return %arg0, %c0_i32, %c0_i32_0 : i32, i32, i32
  }
  func.func @transform_3(%arg0: i32) -> (i32, i32) {
    %c0_i32 = arith.constant 0 : i32
    %c0_i32_0 = arith.constant 0 : i32
    %c0_i32_1 = arith.constant 0 : i32
    return %c0_i32, %c0_i32_0 : i32, i32
  }
  func.func @transform_4(%arg0: i32) -> (i32, i32) {
    %c0_i32 = arith.constant 0 : i32
    %c0_i32_0 = arith.constant 0 : i32
    %c0_i32_1 = arith.constant 0 : i32
    return %c0_i32, %c0_i32_0 : i32, i32
  }
  func.func @transform_5(%arg0: i32) -> (i32, i32, i32) {
    %c0_i32 = arith.constant 0 : i32
    %c0_i32_0 = arith.constant 0 : i32
    %c0_i32_1 = arith.constant 0 : i32
    return %arg0, %c0_i32, %c0_i32_0 : i32, i32, i32
  }
}

</mosaic_0001>

<bundles_post_ra>
// kernel: tpu_custom_call.1
= control target key start
LH: loop header
LB: loop body
LE: loop exit
PB: predicated region body
PF: predicated region fallthrough
CT: control target
= control target key end

     0   :  { %s1751_s0 = inlined_call_operand.hbm [shape: bf16[2,16,128], index: 0, kind: input, shape index: {}]   ;;  %s1752_s1 = inlined_call_operand.hbm [shape: bf16[2,128,128], index: 1, kind: input, shape index: {}]   ;;  %s1753_s2 = inlined_call_operand.vmem [shape: f32[2,1,128], index: 2, kind: input, shape index: {}]   ;;  %s1754_s3 = inlined_call_operand.hbm [shape: bf16[128,128], index: 3, kind: input, shape index: {}]   ;;  %s1755_s4 = inlined_call_operand.vmem [shape: f32[1,128], index: 4, kind: input, shape index: {}]   ;;  %s1756_s5 = inlined_call_operand.hbm [shape: f32[2,16,128], index: 5, kind: output, shape index: {}]  }
   0x1   :  { %1760 = sst [smem:[#allocation14_spill]] %s1751_s0 }
   0x2   :  { %1761 = sst [smem:[#allocation15_spill]] %s1754_s3 }
   0x3   :  { %10 = vsyncpa [#allocation3], 0 }
   0x4   :  { %12 = vsyncpa [#allocation3 + $0x1], 0 }
   0x5   :  { %13 = vsyncpa [#allocation6], 0 }
   0x6   :  { %15 = vsyncpa [#allocation6 + $0x1], 0 }
   0x7   :  { %16 = vsyncpa [#allocation4], 0 }
   0x8   :  { %18 = vsyncpa [#allocation4 + $0x1], 0  ;;  %s1414_s18 = smov 0   ;;  %s1416_s19 = smov 0  }
   0x9   :  { %s1418_s20 = smov 0   ;;  %s1420_s21 = smov 0  }
   0xa LB: > { %s1435_s22 = sadd.s32 4294967295, %s1372_s21   ;;  %s924_s23 = sadd.s32 4294967294, %s1372_s21   ;;  %s1372_s21 = sphi %s1420_s21, %s1783_s21   ;;  %s1368_s20 = sphi %s1418_s20, %s1782_s20   ;;  %s1364_s19 = sphi %s1416_s19, %s1781_s19   ;;  %s1360_s18 = sphi %s1414_s18, %s1780_s18  }
   0xb   : > { %p44_p0 = scmp.ne.s32.totalorder %s1364_s19, %s1360_s18  ;;  %p1757_p1 = scmp.eq.s32.totalorder %s1435_s22, 0 }
   0xc   : > { %p168_p3 = scmp.eq.s32.totalorder %s924_s23, 1  ;;  %p925_p5 = scmp.ge.s32.totalorder %s1372_s21, 1 }
   0xd   : > { %p1444_p4 = por %p1757_p1, %p44_p0  ;;  %p175_p7 = scmp.lt.s32.totalorder %s1372_s21, 3 }
   0xe   : > { %p1449_p6 = por %p168_p3, %p44_p0  ;;  %s1374_s27 = smov [#allocation7]  }
   0xf   : > { %s1762_s24 = scalar_select %p1444_p4, 1, 0 }
  0x10   : > { %s1763_s25 = scalar_select %p1449_p6, 1, 0 }
  0x11   : > { %p1454_p8 = pnand %p925_p5, %p175_p7  ;;  %s187_s28 = sshll.u32 %s1374_s27, 4  ;;  %s1458_s28 = int_to_ptr.vmem [resolvable:$true] %s187_s28 }
  0x12   : > { %s1470_s30 = sadd.s32 1, %s1372_s21   ;;  %s31_s6 = sadd.s32 1, %s1368_s20 }
  0x13   : > { %s1764_s26 = scalar_select %p1454_p8, 1, 0 }
  0x14   : > { %p1119_p9 = pneg %p1454_p8  ;;  %s28_s7 = ssub.s32 %s1372_s21, %s1470_s30 }
  0x15   : > { %s1766_s3 = sld [smem:[#allocation15_spill]] }
  0x16   : > { %p1465_p11 = pnand %p1119_p9, %p1757_p1 }
  0x18   : > { %p1212_p13 = pneg %p1465_p11 }
  0x1b   : > { %s1210_s10 = scalar_lea.hbm %s1766_s3, 1024 }
  0x1c   : > { %p1211_p12 = scmp.ne.s32.totalorder %s1766_s3, %s1210_s10  ;;  %p1217_p5 = scmp.lt.u32.totalorder %s1210_s10, %s1766_s3 }
  0x1e   : > { %p1213_p0 = pnand %p1212_p13, %p1211_p12 }
  0x20   : > { %p1214_p3 = pneg %p1213_p0 }
  0x22   : > { %p1219_p7 = pnand %p1217_p5, %p1214_p3 }
  0x24   : > { %1222 = shalt.err (!%p1219_p7)
}
  0x25   : > { %s1223_s15 = scalar_lea.vmem %s1458_s28, 1024  ;;  %p1231_p2 = scmp.lt.s32.totalorder %s1458_s28, %s1458_s28 }
  0x26   : > { %p1224_p9 = scmp.ne.s32.totalorder %s1458_s28, %s1223_s15  ;;  %p1232_p6 = scmp.lt.s32.totalorder %s1223_s15, %s1223_s15 }
  0x28   : > { %p1226_p10 = pnand %p1224_p9, %p1212_p13  ;;  %p1233_p4 = por %p1232_p6, %p1231_p2 }
  0x2a   : > { %p1227_p1 = pneg %p1226_p10 }
  0x2c   : > { %p1234_p8 = pnand %p1233_p4, %p1227_p1 }
  0x2e   : > { %1237 = shalt.err (!%p1234_p8)
}
  0x2f   : > { %s1375_s16 = smov 64   ;;  %s1376_s17 = smov 4  }
  0x30   : > { %1122 = dma.hbm_to_vmem [thread:$0]  (!%p1465_p11), %s1766_s3, 1024, %s1458_s28, [#allocation6], %s1375_s16, %s1375_s16, %s1376_s17  }
  0x31   : > { %p29_p1 = scmp.eq.s32.totalorder %s28_s7, 0  ;;  %p38_p2 = scmp.ne.s32.totalorder %s1368_s20, %s1364_s19 }
  0x32   : > { %p39_p4 = scmp.eq.s32.totalorder %s1372_s21, 0  ;;  %p1135_p6 = scmp.lt.s32.totalorder %s1372_s21, 2 }
  0x33   : > { %s1504_s8 = scalar_select %p29_p1, %s1368_s20, %s31_s6  }
  0x34   : > { %p40_p8 = por %p39_p4, %p38_p2  ;;  %p1768_p10 = scmp.eq.s32.totalorder %s1435_s22, 1 }
  0x35   : > { %1767 = sst [smem:[#allocation13_spill]] %s1504_s8  ;;  %s1513_s29 = sand.u32 1, %s1368_s20  }
  0x36   : > { %p1508_p12 = por %p1768_p10, %p38_p2  ;;  %s971_s10 = sshll.u32 %s1372_s21, 7 }
  0x37   : > { %s928_s11 = sshll.u32 %s1513_s29, 3  ;;  %s1770_s0 = sld [smem:[#allocation14_spill]] }
  0x38   : > { %s208_s6 = scalar_lea.vmem [#allocation2], %s928_s11  ;;  %p1522_p11 = pnand %p1135_p6, %p40_p8 }
  0x39   : > { %s215_s13 = sshll.u32 %s208_s6, 4  ;;  %s205_s23 = scalar_lea.sflag [#allocation3], %s1513_s29  ;;  %s1526_s13 = int_to_ptr.vmem [resolvable:$true] %s215_s13 }
  0x3a   : > { %p1240_p0 = pneg %p1522_p11 }
  0x3d   : > { %s1520_s7 = scalar_lea.hbm %s1770_s0, %s971_s10  ;;  %s1243_s28 = scalar_lea.hbm %s1770_s0, 256 }
  0x3e   : > { %s1238_s27 = scalar_lea.hbm %s1520_s7, 128  ;;  %p1244_p7 = scmp.lt.u32.totalorder %s1520_s7, %s1770_s0 }
  0x3f   : > { %p1239_p13 = scmp.ne.s32.totalorder %s1520_s7, %s1238_s27  ;;  %p1245_p9 = scmp.lt.u32.totalorder %s1243_s28, %s1238_s27 }
  0x40   : > { %p1247_p2 = scmp.lt.u32.totalorder %s1238_s27, %s1520_s7 }
  0x41   : > { %p1241_p3 = pnand %p1240_p0, %p1239_p13  ;;  %p1246_p1 = por %p1245_p9, %p1244_p7 }
  0x43   : > { %p1242_p5 = pneg %p1241_p3  ;;  %p1248_p4 = por %p1247_p2, %p1246_p1 }
  0x45   : > { %p1249_p6 = pnand %p1248_p4, %p1242_p5 }
  0x47   : > { %1252 = shalt.err (!%p1249_p6)
}
  0x48   : > { %s1253_s15 = scalar_lea.vmem %s1526_s13, 128  ;;  %s1377_s10 = smov [#allocation2]  }
  0x49   : > { %p1254_p8 = scmp.ne.s32.totalorder %s1526_s13, %s1253_s15  ;;  %s1258_s11 = sshll.u32 %s1377_s10, 4  ;;  %s1259_s11 = int_to_ptr.vmem [resolvable:$false] %s1258_s11 }
  0x4a   : > { %s1260_s12 = scalar_lea.vmem %s1259_s11, 256  ;;  %p1261_p3 = scmp.lt.s32.totalorder %s1526_s13, %s1259_s11 }
  0x4b   : > { %p1256_p10 = pnand %p1254_p8, %p1240_p0  ;;  %p1262_p7 = scmp.lt.s32.totalorder %s1260_s12, %s1253_s15 }
  0x4d   : > { %p1257_p13 = pneg %p1256_p10  ;;  %p1263_p9 = por %p1262_p7, %p1261_p3 }
  0x4f   : > { %p1264_p1 = pnand %p1263_p9, %p1257_p13 }
  0x51   : > { %1267 = shalt.err (!%p1264_p1)
}
  0x52   : > { %1126 = dma.hbm_to_vmem [thread:$0]  (!%p1522_p11), %s1520_s7, 128, %s1526_s13, %s205_s23, %s1375_s16, %s1375_s16, %s1376_s17  }
  0x53   : > { %s931_s27 = sshll.u32 %s1513_s29, 6  ;;  %s972_s28 = sshll.u32 %s1372_s21, 10 }
  0x54   : > { %s1565_s10 = scalar_lea.hbm %s1752_s1, %s972_s28  ;;  %s229_s11 = scalar_lea.vmem [#allocation5], %s931_s27 }
  0x55   : > { %s236_s12 = sshll.u32 %s229_s11, 4  ;;  %s1772_s0 = sand.u32 1, %s1372_s21   ;;  %s1567_s12 = int_to_ptr.vmem [resolvable:$true] %s236_s12 }
  0x56   : > { %s1571_s3 = scalar_lea.sflag [#allocation6], %s1772_s0  ;;  %s1268_s8 = scalar_lea.hbm %s1565_s10, 1024 }
  0x57   : > { %p1269_p5 = scmp.ne.s32.totalorder %s1565_s10, %s1268_s8  ;;  %s1273_s13 = scalar_lea.hbm %s1752_s1, 2048 }
  0x58   : > { %p1274_p6 = scmp.lt.u32.totalorder %s1565_s10, %s1752_s1  ;;  %p1275_p8 = scmp.lt.u32.totalorder %s1273_s13, %s1268_s8 }
  0x59   : > { %p1271_p2 = pnand %p1269_p5, %p1240_p0  ;;  %p1277_p13 = scmp.lt.u32.totalorder %s1268_s8, %s1565_s10 }
  0x5a   : > { %p1276_p10 = por %p1275_p8, %p1274_p6 }
  0x5b   : > { %p1272_p4 = pneg %p1271_p2 }
  0x5c   : > { %p1278_p3 = por %p1277_p13, %p1276_p10 }
  0x5e   : > { %p1279_p7 = pnand %p1278_p3, %p1272_p4 }
  0x60   : > { %1282 = shalt.err (!%p1279_p7)
}
  0x61   : > { %s1283_s0 = scalar_lea.vmem %s1567_s12, 1024  ;;  %s1378_s27 = smov [#allocation5]  }
  0x62   : > { %p1284_p9 = scmp.ne.s32.totalorder %s1567_s12, %s1283_s0  ;;  %s1288_s15 = sshll.u32 %s1378_s27, 4  ;;  %s1289_s15 = int_to_ptr.vmem [resolvable:$false] %s1288_s15 }
  0x63   : > { %s1290_s6 = scalar_lea.vmem %s1289_s15, 2048  ;;  %p1291_p2 = scmp.lt.s32.totalorder %s1567_s12, %s1289_s15 }
  0x64   : > { %p1286_p1 = pnand %p1284_p9, %p1240_p0  ;;  %p1292_p6 = scmp.lt.s32.totalorder %s1290_s6, %s1283_s0 }
  0x66   : > { %p1287_p5 = pneg %p1286_p1  ;;  %p1293_p8 = por %p1292_p6, %p1291_p2 }
  0x68   : > { %p1294_p10 = pnand %p1293_p8, %p1287_p5 }
  0x6a   : > { %1297 = shalt.err (!%p1294_p10)
}
  0x6b   : > { %1129 = dma.hbm_to_vmem [thread:$0]  (!%p1522_p11), %s1565_s10, 1024, %s1567_s12, %s1571_s3, %s1375_s16, %s1375_s16, %s1376_s17  }
  0x6c   : > { %p1773_p0 = scmp.ne.s32.totalorder %s1764_s26, 0 }
  0x6d   : > { %s1603_s8 = sand.u32 (!%p1773_p0), 1, %s1364_s19   ;;  %p1774_p4 = scmp.ne.s32.totalorder (!%p1773_p0), %s1762_s24, 0 }
  0x6e   : > { %254 = sbr.rel (%p1773_p0) target bundleno = 1203 (0x4b3), region = 40  ;;  %s935_s11 = sshll.u32 (!%p1773_p0), %s1603_s8, 3 }
  0x6f   : > { %s257_s29 = scalar_lea.sflag (!%p1773_p0), [#allocation3], %s1603_s8  ;;  %s1607_s7 = scalar_lea.vmem (!%p1773_p0), [#allocation2], %s935_s11 }
  0x75   : > { %1343 = dma.done.wait (%p1774_p4), %s257_s29, 128  }
  0x76   : > { %1345 = vsyncadd (%p1774_p4), %s257_s29, 4294967168  ;;  %s265_s3 = sand.u32 1, %s1435_s22   ;;  %s936_s26 = sshll.u32 %s1603_s8, 6 }
  0x77   : > { %s266_s16 = scalar_lea.sflag [#allocation6], %s265_s3  ;;  %s1615_s17 = scalar_lea.vmem [#allocation5], %s936_s26 }
  0x78   : > { %1347 = dma.done.wait (%p1774_p4), %s266_s16, 1024  }
  0x79   : > { %1349 = vsyncadd (%p1774_p4), %s266_s16, 4294966272  ;;  %p1775_p11 = scmp.eq.s32.totalorder %s1435_s22, 0 }
  0x7b   : > { %1351 = dma.done.wait (%p1775_p11), [#allocation6], 1024   ;;  %p1776_p13 = pmov %p1775_p11 }
  0x7c   : > { %v1379_v0 = vmov 0.0   ;;  %vm1380_vm0 = vmmov 0   ;;  %v1177_v1 = vld [vmem:[#allocation7] sm:$0xff]   ;;  %v1178_v2 = vld [vmem:[#allocation7 + $0x8] sm:$0xff]   ;;  %v1179_v3 = vld [vmem:[#allocation7 + $0x10] sm:$0xff]   ;;  %p308_p3 = scmp.lt.s32.totalorder %s1435_s22, 1 }
  0x7d   : > { %1353 = vsyncadd (%p1776_p13), [#allocation6], 4294966272  ;;  %1017 = vmatprep.subr.bf16.mxu0 %v1379_v0  ;;  %1033 = vmatprep.mubr.msk.bf16.mxu0 %vm1380_vm0, %v1379_v0  ;;  %v1180_v4 = vld [vmem:[#allocation7 + $0x18] sm:$0xff]   ;;  %v1185_v5 = vld [vmem:[%s1615_s17] sm:$0xff]   ;;  %s938_s28 = sshll.u32 %s1603_s8, 4  ;;  %s973_s15 = sshll.u32 %s1435_s22, 8 }
  0x7e   : > { %1037 = vmatprep.subr.bf16.mxu1 %v1177_v1  ;;  %1018 = vmatpush3.bf16.msra.mxu0 %v1177_v1  ;;  %v1181_v6 = vld [vmem:[#allocation7 + $0x20] sm:$0xff]   ;;  %v1182_v7 = vld [vmem:[#allocation7 + $0x28] sm:$0xff]   ;;  %v1183_v8 = vld [vmem:[#allocation7 + $0x30] sm:$0xff]   ;;  %s309_s10 = scalar_select %p308_p3, %s1435_s22, 1 }
  0x7f   : > { %1038 = vmatpush3.bf16.msra.mxu1 %v1177_v1  ;;  %1019 = vmatprep.subr.bf16.mxu0 %v1379_v0  ;;  %v1184_v9 = vld [vmem:[#allocation7 + $0x38] sm:$0xff]   ;;  %v1186_v11 = vld [vmem:[%s1615_s17 + $0x8] sm:$0xff]   ;;  %v1187_v12 = vld [vmem:[%s1615_s17 + $0x10] sm:$0xff]   ;;  %s307_s0 = scalar_lea.vmem [#allocation8], %s938_s28  ;;  %s1707_s29 = scalar_lea.hbm %s1756_s5, %s973_s15 }
  0x80   : > { %1039 = vmatprep.subr.bf16.mxu1 %v1178_v2  ;;  %1053 = vmatprep.mubr.bf16.mxu1 %v1185_v5  ;;  %v1193_v10 = vld [vmem:[%s1607_s7] sm:$0xff]   ;;  %v1189_v14 = vld [vmem:[%s1615_s17 + $0x20] sm:$0xff]   ;;  %v1190_v15 = vld [vmem:[%s1615_s17 + $0x28] sm:$0xff]   ;;  %s310_s23 = scalar_lea.vmem %s1753_s2, %s309_s10  ;;  %s810_s27 = sshll.u32 %s307_s0, 4  ;;  %s1702_s27 = int_to_ptr.vmem [resolvable:$true] %s810_s27 }
  0x81   : > { %v1188_v13 = vld [vmem:[%s1615_s17 + $0x18] sm:$0xff]   ;;  %v1191_v16 = vld [vmem:[%s1615_s17 + $0x30] sm:$0xff]   ;;  %s797_s7 = scalar_lea.sflag [#allocation4], %s1603_s8  ;;  %s1298_s3 = scalar_lea.vmem %s1702_s27, 256 }
  0x82   : > { %1020 = vmatpush3.bf16.msra.mxu0 %v1178_v2  ;;  %v1192_v17 = vld [vmem:[%s1615_s17 + $0x38] sm:$0xff]   ;;  %v1653_v18 = vld [vmem:[%s1755_s4] ss:$0 sm:$0xff]  ;;  %p1299_p7 = scmp.ne.s32.totalorder %s1702_s27, %s1298_s3  ;;  %s1381_s22 = smov [#allocation8]  }
  0x83   : > { %1040 = vmatpush3.bf16.msra.mxu1 %v1178_v2  ;;  %1021 = vmatprep.subr.bf16.mxu0 %v1379_v0  ;;  %s1302_s26 = sshll.u32 %s1381_s22, 4  ;;  %s1303_s26 = int_to_ptr.vmem [resolvable:$false] %s1302_s26 }
  0x84   : > { %1041 = vmatprep.subr.bf16.mxu1 %v1179_v3  ;;  %p1300_p9 = pnand %p1299_p7, %p1508_p12  ;;  %s1304_s16 = scalar_lea.vmem %s1303_s26, 512 }
  0x85   : > { %p1305_p5 = scmp.lt.s32.totalorder %s1702_s27, %s1303_s26  ;;  %p1306_p2 = scmp.lt.s32.totalorder %s1304_s16, %s1298_s3 }
  0x86   : > { %1022 = vmatpush3.bf16.msra.mxu0 %v1179_v3  ;;  %p1301_p1 = pneg %p1300_p9 }
  0x87   : > { %1042 = vmatpush3.bf16.msra.mxu1 %v1179_v3  ;;  %1023 = vmatprep.subr.bf16.mxu0 %v1379_v0  ;;  %p1307_p6 = por %p1306_p2, %p1305_p5 }
  0x88   : > { %1043 = vmatprep.subr.bf16.mxu1 %v1180_v4 }
  0x89   : > { %p1308_p8 = pnand %p1307_p6, %p1301_p1 }
  0x8a   : > { %1024 = vmatpush3.bf16.msra.mxu0 %v1180_v4 }
  0x8b   : > { %1044 = vmatpush3.bf16.msra.mxu1 %v1180_v4  ;;  %1025 = vmatprep.subr.bf16.mxu0 %v1379_v0 }
  0x8c   : > { %1045 = vmatprep.subr.bf16.mxu1 %v1181_v6 }
  0x8e   : > { %1026 = vmatpush3.bf16.msra.mxu0 %v1181_v6 }
  0x8f   : > { %1046 = vmatpush3.bf16.msra.mxu1 %v1181_v6  ;;  %1027 = vmatprep.subr.bf16.mxu0 %v1379_v0 }
  0x90   : > { %1047 = vmatprep.subr.bf16.mxu1 %v1182_v7 }
  0x92   : > { %1028 = vmatpush3.bf16.msra.mxu0 %v1182_v7 }
  0x93   : > { %1048 = vmatpush3.bf16.msra.mxu1 %v1182_v7  ;;  %1029 = vmatprep.subr.bf16.mxu0 %v1379_v0 }
  0x94   : > { %1049 = vmatprep.subr.bf16.mxu1 %v1183_v8 }
  0x96   : > { %1030 = vmatpush3.bf16.msra.mxu0 %v1183_v8 }
  0x97   : > { %1050 = vmatpush3.bf16.msra.mxu1 %v1183_v8  ;;  %1031 = vmatprep.subr.bf16.mxu0 %v1379_v0 }
  0x98   : > { %1051 = vmatprep.subr.bf16.mxu1 %v1184_v9 }
  0x9a   : > { %1032 = vmatpush3.bf16.msra.mxu0 %v1184_v9 }
  0x9b   : > { %1052 = vmatpush3.bf16.msra.mxu1 %v1184_v9  ;;  %1069 = vmatprep.subr.bf16.mxu0 %v1379_v0 }
  0x9c   : > { %1089 = vmatprep.subr.bf16.mxu1 %v1379_v0 }
  0x9d   : > { %1034 = vmatmul.mubr.bf16.vlgmr.msra.gmra.mrb[0].mxu0 %v1193_v10 }
  0x9e   : > { %1054 = vmatmul.mubr.bf16.vlgmr.msra.gmra.mrb[0].mxu1 %v1186_v11  ;;  %1085 = vmatprep.mubr.msk.bf16.mxu0 %vm1380_vm0, %v1379_v0 }
  0x9f   : > { %1057 = vmatprep.mubr.bf16.mxu1 %v1187_v12 }
  0xa6   : > { %1058 = vmatmul.mubr.bf16.gmra.mrb[4].mxu1 %v1188_v13 }
  0xa7   : > { %1061 = vmatprep.mubr.bf16.mxu1 %v1189_v14 }
  0xae   : > { %1062 = vmatmul.mubr.bf16.gmra.mrb[8].mxu1 %v1190_v15 }
  0xaf   : > { %1065 = vmatprep.mubr.bf16.mxu1 %v1191_v16 }
  0xb6   : > { %1066 = vmatmul.mubr.bf16.gmra.mrb[12].mxu1 %v1192_v17 }
  0xb7   : > { %1105 = vmatprep.mubr.msk.bf16.mxu1 %vm1380_vm0, %v1379_v0 }
 0x170   : > { %v441_v19 = vpop.f32.mrb[0].mxu0 }
 0x171   : > { %v1055_v20 = vpop.f32.mrb[0].mxu1  ;;  %v442_v21 = vadd.f32 %v1653_v18, %v441_v19  ;;  %v1035_v22 = vpop.f32.mrb[1].mxu0 }
 0x172   : > { %v541_v23 = vadd.f32 %v1055_v20, %v1653_v18  ;;  %v532_v24 = vpop.f32.mrb[1].mxu1  ;;  %v444_v25 = vpop.f32.mrb[2].mxu0 }
 0x173   : > { %v533_v26 = vadd.f32 %v1653_v18, %v532_v24  ;;  %v1056_v27 = vpop.f32.mrb[2].mxu1  ;;  %v448_v28 = vmax.f32 %v442_v21, 0.0  ;;  %v445_v29 = vadd.f32 %v1653_v18, %v444_v25  ;;  %v1036_v30 = vpop.f32.mrb[3].mxu0 }
 0x174   : > { %v544_v31 = vadd.f32 %v1056_v27, %v1653_v18  ;;  %v535_v32 = vpop.f32.mrb[3].mxu1  ;;  %v597_v35 = vmax.f32 %v541_v23, 0.0  ;;  %v1196_v30 = vld [vmem:[%s1615_s17 + $0x10] sm:$0xff]  }
 0x175   : > { %v536_v33 = vadd.f32 %v1653_v18, %v535_v32  ;;  %v449_v34 = vmax.f32 %v445_v29, 0.0  ;;  %v595_v37 = vmax.f32 %v533_v26, 0.0  ;;  %v1195_v29 = vld [vmem:[%s1615_s17 + $0x8] sm:$0xff]  }
 0x176   : > { %v598_v36 = vmax.f32 %v544_v31, 0.0  ;;  %v1197_v31 = vld [vmem:[%s1615_s17 + $0x18] sm:$0xff]  }
 0x177   : > { %v596_v38 = vmax.f32 %v536_v33, 0.0  ;;  %v611_v39 = vpack.c.bf16 %v449_v34, %v448_v28  ;;  %v1194_v28 = vld [vmem:[%s1615_s17] sm:$0xff]  }
 0x178   : > { %v613_v40 = vpack.c.bf16 %v598_v36, %v597_v35  ;;  %1090 = vmatpush3.bf16.msra.mxu1 %v1194_v28 }
 0x179   : > { %v612_v41 = vpack.c.bf16 %v596_v38, %v595_v37  ;;  %v1059_v42 = vpop.f32.mrb[4].mxu1  ;;  %1091 = vmatprep.subr.bf16.mxu1 %v1379_v0 }
 0x17a   : > { %v557_v43 = vadd.f32 %v1059_v42, %v1653_v18  ;;  %v548_v44 = vpop.f32.mrb[5].mxu1  ;;  %v1200_v42 = vld [vmem:[%s1615_s17 + $0x30] sm:$0xff]  }
 0x17b   : > { %1070 = vmatpush3.bf16.xpose.msra.mxu0 %v612_v41  ;;  %v549_v45 = vadd.f32 %v1653_v18, %v548_v44  ;;  %v1060_v46 = vpop.f32.mrb[6].mxu1  ;;  %v1199_v41 = vld [vmem:[%s1615_s17 + $0x28] sm:$0xff]  }
 0x17c   : > { %v601_v47 = vmax.f32 %v557_v43, 0.0  ;;  %v560_v48 = vadd.f32 %v1060_v46, %v1653_v18  ;;  %v551_v49 = vpop.f32.mrb[7].mxu1  ;;  %1071 = vmatprep.subr.bf16.mxu0 %v1379_v0  ;;  %1092 = vmatpush3.bf16.msra.mxu1 %v1195_v29  ;;  %v1201_v43 = vld [vmem:[%s1615_s17 + $0x38] sm:$0xff]  }
 0x17d   : > { %v599_v50 = vmax.f32 %v549_v45, 0.0  ;;  %v552_v51 = vadd.f32 %v1653_v18, %v551_v49  ;;  %1093 = vmatprep.subr.bf16.mxu1 %v1379_v0 }
 0x17e   : > { %v602_v52 = vmax.f32 %v560_v48, 0.0 }
 0x17f   : > { %v600_v53 = vmax.f32 %v552_v51, 0.0 }
 0x180   : > { %v615_v54 = vpack.c.bf16 %v602_v52, %v601_v47  ;;  %1094 = vmatpush3.bf16.msra.mxu1 %v1196_v30 }
 0x181   : > { %v614_v55 = vpack.c.bf16 %v600_v53, %v599_v50  ;;  %v1063_v56 = vpop.f32.mrb[8].mxu1  ;;  %1095 = vmatprep.subr.bf16.mxu1 %v1379_v0 }
 0x182   : > { %v573_v57 = vadd.f32 %v1063_v56, %v1653_v18  ;;  %v564_v58 = vpop.f32.mrb[9].mxu1 }
 0x183   : > { %1072 = vmatpush3.bf16.xpose.msra.mxu0 %v613_v40  ;;  %v565_v59 = vadd.f32 %v1653_v18, %v564_v58  ;;  %v1064_v60 = vpop.f32.mrb[10].mxu1  ;;  %v1198_v40 = vld [vmem:[%s1615_s17 + $0x20] sm:$0xff]  }
 0x184   : > { %1073 = vmatprep.subr.bf16.mxu0 %v1379_v0  ;;  %v605_v61 = vmax.f32 %v573_v57, 0.0  ;;  %v576_v62 = vadd.f32 %v1064_v60, %v1653_v18  ;;  %v567_v63 = vpop.f32.mrb[11].mxu1  ;;  %1096 = vmatpush3.bf16.msra.mxu1 %v1197_v31 }
 0x185   : > { %v603_v1 = vmax.f32 %v565_v59, 0.0  ;;  %v568_v2 = vadd.f32 %v1653_v18, %v567_v63  ;;  %1097 = vmatprep.subr.bf16.mxu1 %v1379_v0 }
 0x186   : > { %v606_v3 = vmax.f32 %v576_v62, 0.0 }
 0x187   : > { %v604_v4 = vmax.f32 %v568_v2, 0.0 }
 0x188   : > { %v617_v5 = vpack.c.bf16 %v606_v3, %v605_v61  ;;  %1098 = vmatpush3.bf16.msra.mxu1 %v1198_v40 }
 0x189   : > { %v616_v6 = vpack.c.bf16 %v604_v4, %v603_v1  ;;  %v1067_v7 = vpop.f32.mrb[12].mxu1  ;;  %1099 = vmatprep.subr.bf16.mxu1 %v1379_v0 }
 0x18a   : > { %v589_v8 = vadd.f32 %v1067_v7, %v1653_v18  ;;  %v580_v9 = vpop.f32.mrb[13].mxu1 }
 0x18b   : > { %1074 = vmatpush3.bf16.xpose.msra.mxu0 %v614_v55  ;;  %v581_v10 = vadd.f32 %v1653_v18, %v580_v9  ;;  %v1068_v11 = vpop.f32.mrb[14].mxu1 }
 0x18c   : > { %1075 = vmatprep.subr.bf16.mxu0 %v1379_v0  ;;  %v609_v12 = vmax.f32 %v589_v8, 0.0  ;;  %v592_v13 = vadd.f32 %v1068_v11, %v1653_v18  ;;  %v583_v14 = vpop.f32.mrb[15].mxu1  ;;  %1100 = vmatpush3.bf16.msra.mxu1 %v1199_v41 }
 0x18d   : > { %v607_v15 = vmax.f32 %v581_v10, 0.0  ;;  %v584_v16 = vadd.f32 %v1653_v18, %v583_v14  ;;  %v957_v18 = vld [vmem:[%s310_s23] ss:$0 sm:$0xff]  ;;  %1101 = vmatprep.subr.bf16.mxu1 %v1379_v0 }
 0x18e   : > { %v610_v17 = vmax.f32 %v592_v13, 0.0 }
 0x18f   : > { %v608_v19 = vmax.f32 %v584_v16, 0.0 }
 0x190   : > { %v619_v20 = vpack.c.bf16 %v610_v17, %v609_v12  ;;  %1102 = vmatpush3.bf16.msra.mxu1 %v1200_v42 }
 0x191   : > { %v618_v21 = vpack.c.bf16 %v608_v19, %v607_v15  ;;  %1103 = vmatprep.subr.bf16.mxu1 %v1379_v0 }
 0x193   : > { %1076 = vmatpush3.bf16.xpose.msra.mxu0 %v615_v54 }
 0x194   : > { %1077 = vmatprep.subr.bf16.mxu0 %v1379_v0  ;;  %1104 = vmatpush3.bf16.msra.mxu1 %v1201_v43 }
 0x19b   : > { %1078 = vmatpush3.bf16.xpose.msra.mxu0 %v616_v6 }
 0x19c   : > { %1079 = vmatprep.subr.bf16.mxu0 %v1379_v0 }
 0x1a3   : > { %1080 = vmatpush3.bf16.xpose.msra.mxu0 %v617_v5 }
 0x1a4   : > { %1081 = vmatprep.subr.bf16.mxu0 %v1379_v0 }
 0x1ab   : > { %1082 = vmatpush3.bf16.xpose.msra.mxu0 %v618_v21 }
 0x1ac   : > { %1083 = vmatprep.subr.bf16.mxu0 %v1379_v0 }
 0x1b3   : > { %1084 = vmatpush3.bf16.xpose.msra.mxu0 %v619_v20 }
 0x1ba   : > { %1086 = vmatmul.mubr.bf16.vlgmr.msra.gmra.mrb[4].mxu0 %v611_v39 }
 0x28d   : > { %v661_v22 = vpop.f32.mrb[4].mxu0 }
 0x28e   : > { %v662_v23 = vadd.f32 %v957_v18, %v661_v22  ;;  %v1087_v24 = vpop.f32.mrb[5].mxu0 }
 0x28f   : > { %v664_v25 = vpop.f32.mrb[6].mxu0 }
 0x290   : > { %668 = vmax.xlane.f32.xlu0 %v662_v23  ;;  %v1088_v26 = vpop.f32.mrb[7].mxu0  ;;  %v665_v27 = vadd.f32 %v957_v18, %v664_v25 }
 0x294   : > { %670 = vmax.xlane.f32.xlu0 %v665_v27 }
 0x31d   : > { %v669_v32 = vpop.xlane.xlu0 %668 }
 0x31e   : > { %v672_v33 = vsub.f32 %v662_v23, %v669_v32 }
 0x320   : > { %v674_v34 = vmul.f32 1.442695, %v672_v33 }
 0x321   : > { %v671_v35 = vpop.xlane.xlu0 %670 }
 0x322   : > { %1202 = vpow2.f32 %v674_v34  ;;  %v673_v36 = vsub.f32 %v665_v27, %v671_v35 }
 0x324   : > { %v676_v37 = vmul.f32 1.442695, %v673_v36 }
 0x326   : > { %1204 = vpow2.f32 %v676_v37 }
 0x32c   : > { %v1203_v38 = vpop.eup %1202 }
 0x32d   : > { %678 = vadd.xlane.f32.xlu1 %v1203_v38 }
 0x330   : > { %v1205_v39 = vpop.eup %1204 }
 0x331   : > { %680 = vadd.xlane.f32.xlu1 %v1205_v39 }
 0x3ba   : > { %v679_v44 = vpop.xlane.xlu1 %678 }
 0x3bb   : > { %1206 = vrcp.f32 %v679_v44 }
 0x3be   : > { %v681_v45 = vpop.xlane.xlu1 %680 }
 0x3bf   : > { %1208 = vrcp.f32 %v681_v45 }
 0x3c5   : > { %v1207_v46 = vpop.eup %1206 }
 0x3c6   : > { %v686_v48 = vmul.f32 %v1207_v46, %v1203_v38 }
 0x3c9   : > { %v1209_v47 = vpop.eup %1208 }
 0x3ca   : > { %v687_v49 = vmul.f32 %v1209_v47, %v1205_v39 }
 0x3cc   : > { %v688_v50 = vpack.c.bf16 %v687_v49, %v686_v48 }
 0x3ce   : > { %1106 = vmatmul.mubr.bf16.vlgmr.msra.gmra.mrb[16].mxu1 %v688_v50 }
 0x4a1   : > { %v787_v0 = vpop.f32.mrb[16].mxu1 }
 0x4a2   : > { %794 = vst [vmem:[%s307_s0] sm:$0xff] %v787_v0  ;;  %v1107_v51 = vpop.f32.mrb[17].mxu1 }
 0x4a3   : > { %v790_v52 = vpop.f32.mrb[18].mxu1 }
 0x4a4   : > { %795 = vst [vmem:[%s307_s0 + $0x8] sm:$0xff] %v790_v52  ;;  %v1108_v53 = vpop.f32.mrb[19].mxu1 }
 0x4a5   : > { %1311 = shalt.err (!%p1308_p8)
}
 0x4a6   : > { %s1312_s17 = scalar_lea.hbm %s1707_s29, 256  ;;  %s1316_s10 = scalar_lea.hbm %s1756_s5, 512 }
 0x4a7   : > { %p1313_p10 = scmp.ne.s32.totalorder %s1707_s29, %s1312_s17  ;;  %p1317_p11 = scmp.lt.u32.totalorder %s1707_s29, %s1756_s5 }
 0x4a8   : > { %p1318_p13 = scmp.lt.u32.totalorder %s1316_s10, %s1312_s17  ;;  %p1320_p7 = scmp.lt.u32.totalorder %s1312_s17, %s1707_s29 }
 0x4a9   : > { %p1314_p0 = pnand %p1313_p10, %p1508_p12 }
 0x4aa   : > { %p1319_p3 = por %p1318_p13, %p1317_p11 }
 0x4ab   : > { %p1315_p4 = pneg %p1314_p0 }
 0x4ac   : > { %p1321_p9 = por %p1320_p7, %p1319_p3 }
 0x4ae   : > { %p1322_p1 = pnand %p1321_p9, %p1315_p4 }
 0x4b0   : > { %1325 = shalt.err (!%p1322_p1)
}
 0x4b1   : > { %s1382_s23 = smov 128   ;;  %s1383_s28 = smov 8  }
 0x4b2   : > { %1117 = dma.vmem_to_hbm [thread:$0]  (%p1508_p12), %s1702_s27, 256, %s1707_s29, %s797_s7, %s1382_s23, %s1382_s23, %s1383_s28  }
 0x4b3 PF: > { %s825_s0 = sand.u32 1, %s1360_s18   ;;  %p1777_p5 = scmp.ne.s32.totalorder %s1763_s25, 0 }
 0x4b4   : > { %p1778_p2 = scmp.ge.s32.totalorder %s1372_s21, 2  ;;  %s826_s15 = scalar_lea.sflag [#allocation4], %s825_s0 }
 0x4b6   : > { %p1131_p6 = pnand %p1778_p2, %p1777_p5 }
 0x4b8   : > { %1355 = dma.done.wait (!%p1131_p6), %s826_s15, 256  }
 0x4b9   : > { %1357 = vsyncadd (!%p1131_p6), %s826_s15, 4294967040  ;;  %s1779_s6 = sld [smem:[#allocation13_spill]]  ;;  %p21_p8 = scmp.ge.s32.totalorder %s1470_s30, 4  }
 0x4ba   : > { %s1780_s18 = smov %s1364_s19  ;;  %s1781_s19 = smov %s1368_s20 }
 0x4bb   : > { %s1783_s21 = smov %s1470_s30  ;;  %23 = sbr.rel (!%p21_p8) target bundleno = 10 (0xa), region = 105 }
 0x4bf   : > { %s1782_s20 = smov %s1779_s6 }
 0x4c2   :  { %831 = vsyncpa [#allocation3], 1 }
 0x4c3   :  { %833 = vsyncpa [#allocation3 + $0x1], 1 }
 0x4c4   :  { %834 = vsyncpa [#allocation6], 1 }
 0x4c5   :  { %836 = vsyncpa [#allocation6 + $0x1], 1 }
 0x4c6   :  { %837 = vsyncpa [#allocation4], 1 }
 0x4c7   :  { %839 = vsyncpa [#allocation4 + $0x1], 1 }

</bundles_post_ra>
